<compile_context>
chip_gen: v7x
topology: tpu7x:2x2x1
jax: 0.10.0
libtpu: 0.0.40
codegen_flags: <defaults>
</compile_context>

<pallas_src>
from dataclasses import dataclass

import jax
import jax.numpy as jnp
from jax import lax
from jax.experimental import pallas as pl
from jax.experimental.pallas import tpu as pltpu


@dataclass
class ModelConfig:
    num_nodes: int = 10
    seq_len: int = 12
    pred_len: int = 3
    num_features: int = 64
    hidden_dim: int = 128


LN_EPS = 1e-5


# ----------------------------------------------------------------------------
# MLP variant:  out = ReLU(LayerNorm(x @ W + b)) + x     (LayerNorm over last dim)
# ----------------------------------------------------------------------------
def _mlp_kernel(x_ref, w_ref, b_ref, g_ref, bt_ref, o_ref):
    x = x_ref[...]                                            # (TM, H) f32
    y = jnp.dot(x.astype(jnp.bfloat16), w_ref[...],           # bf16 x bf16, f32 acc
                preferred_element_type=jnp.float32) + b_ref[...]
    mu = jnp.mean(y, axis=-1, keepdims=True)
    var = jnp.mean(jnp.square(y - mu), axis=-1, keepdims=True)
    yn = (y - mu) * lax.rsqrt(var + LN_EPS)
    yn = yn * g_ref[...] + bt_ref[...]
    o_ref[...] = jnp.maximum(yn, 0.0) + x                     # residual in f32


def mlp_spatial_processor(x, w, b, gamma, beta, *, tile_rows=None):
    """x: (..., H) f32.  w: (H, H) already transposed so y = x @ w + b."""
    orig_shape = x.shape
    H = orig_shape[-1]
    rows = x.size // H
    xf = x.reshape(rows, H)

    if tile_rows is None:
        # Largest row tile (<= 1024) that still gives >= 2 grid steps so the
        # "parallel" grid axis can be split across both v7x TensorCores.
        half = (rows // 2) // 8 * 8
        tile_rows = min(1024, half) if half >= 8 else rows

    grid = pl.cdiv(rows, tile_rows)
    rows_p = grid * tile_rows
    if rows_p != rows:
        xf = jnp.pad(xf, ((0, rows_p - rows), (0, 0)))

    w_bf = w.astype(jnp.bfloat16)
    b2 = b.reshape(1, H).astype(jnp.float32)
    g2 = gamma.reshape(1, H).astype(jnp.float32)
    bt2 = beta.reshape(1, H).astype(jnp.float32)

    out = pl.pallas_call(
        _mlp_kernel,
        out_shape=jax.ShapeDtypeStruct((rows_p, H), jnp.float32),
        grid_spec=pltpu.PrefetchScalarGridSpec(
            num_scalar_prefetch=0,
            grid=(grid,),
            in_specs=[
                pl.BlockSpec((tile_rows, H), lambda i: (i, 0)),
                pl.BlockSpec((H, H), lambda i: (0, 0)),
                pl.BlockSpec((1, H), lambda i: (0, 0)),
                pl.BlockSpec((1, H), lambda i: (0, 0)),
                pl.BlockSpec((1, H), lambda i: (0, 0)),
            ],
            out_specs=pl.BlockSpec((tile_rows, H), lambda i: (i, 0)),
        ),
        compiler_params=pltpu.CompilerParams(dimension_semantics=("parallel",)),
    )(xf, w_bf, b2, g2, bt2)

    if rows_p != rows:
        out = out[:rows]
    return out.reshape(orig_shape)


# ----------------------------------------------------------------------------
# CNN variant (NCHW):
#   out = ReLU(LayerNorm_{[C,N,S]}(Conv2d_3x3_samepad(x))) + x
#
# Per batch sample the kernel works on the (C, NS) slab (NS = N*S lanes):
#   for each of the 9 taps:  sel_t = mask_t * roll(x, -off_t)   (XLU+VPU, no MXU)
#   sel = concat_t(sel_t)  in VMEM  -> one MXU matmul  W_cat (C,9C) @ sel (9C,NS)
#   then conv bias, whole-sample LayerNorm (matches nn.LayerNorm([C, N, S])),
#   affine, ReLU, residual — all in f32.
# Best when NS is a multiple of 128 (lane-dense slabs).
# ----------------------------------------------------------------------------
def _make_cnn_kernel(S, NS):
    def kernel(x_ref, w_ref, m_ref, b_ref, g_ref, bt_ref, o_ref):
        x = x_ref[...]                                        # (C, NS) f32
        xb = x.astype(jnp.bfloat16)
        taps = []
        for t in range(9):
            dh, dw = t // 3 - 1, t % 3 - 1
            off = dh * S + dw
            # sel[:, r] = x[:, r + off] inside the image, 0 outside (zero pad).
            shifted = xb if off == 0 else pltpu.roll(xb, (-off) % NS, axis=1)
            taps.append(shifted * m_ref[t])                   # (C, NS) bf16
        sel = jnp.concatenate(taps, axis=0)                   # (9C, NS) VMEM im2col
        y = jnp.dot(w_ref[...], sel,                          # single MXU matmul
                    preferred_element_type=jnp.float32) + b_ref[...]
        mu = jnp.mean(y, keepdims=True)                       # LN over whole sample
        var = jnp.mean(jnp.square(y - mu), keepdims=True)
        yn = (y - mu) * lax.rsqrt(var + LN_EPS)
        yn = yn * g_ref[...] + bt_ref[...]
        o_ref[...] = jnp.maximum(yn, 0.0) + x                 # residual in f32
    return kernel


def _make_tap_masks(N, S):
    """(9, 1, NS) 0/1 bf16 masks: mask[t, 0, r] = 1 iff pixel r shifted by tap t
    stays inside the N x S image (zero padding of the 3x3 'same' conv)."""
    NS = N * S
    r = jnp.arange(NS, dtype=jnp.int32)
    n_idx, s_idx = r // S, r % S
    masks = []
    for t in range(9):
        dh, dw = t // 3 - 1, t % 3 - 1
        valid = ((n_idx + dh >= 0) & (n_idx + dh < N) &
                 (s_idx + dw >= 0) & (s_idx + dw < S))
        masks.append(valid)
    return jnp.stack(masks).astype(jnp.bfloat16).reshape(9, 1, NS)


def cnn_spatial_processor(x_nchw, w_oihw, conv_b, gamma_cns, beta_cns):
    """x_nchw: (B, C, N, S).  w_oihw: (C_out, C_in, 3, 3) (PyTorch Conv2d layout).
    gamma_cns/beta_cns: (C, N, S) as in nn.LayerNorm([C, N, S])."""
    B, C, N, S = x_nchw.shape
    NS = N * S

    x = x_nchw.reshape(B, C, NS)                              # free reshape (NCHW)
    # Stacked tap weights: W_cat[o, t*C + i] = w_oihw[o, i, t//3, t%3]
    w_cat = jnp.transpose(w_oihw, (0, 2, 3, 1)).reshape(C, 9 * C).astype(jnp.bfloat16)
    masks = _make_tap_masks(N, S)                             # (9, 1, NS) bf16
    b_col = conv_b.reshape(C, 1).astype(jnp.float32)
    g = gamma_cns.reshape(C, NS).astype(jnp.float32)
    bt = beta_cns.reshape(C, NS).astype(jnp.float32)

    out = pl.pallas_call(
        _make_cnn_kernel(S, NS),
        out_shape=jax.ShapeDtypeStruct((B, C, NS), jnp.float32),
        grid_spec=pltpu.PrefetchScalarGridSpec(
            num_scalar_prefetch=0,
            grid=(B,),                                        # >=2 parallel steps at B>=2
            in_specs=[
                pl.BlockSpec((None, C, NS), lambda b: (b, 0, 0)),
                pl.BlockSpec((C, 9 * C), lambda b: (0, 0)),
                pl.BlockSpec((9, 1, NS), lambda b: (0, 0, 0)),
                pl.BlockSpec((C, 1), lambda b: (0, 0)),
                pl.BlockSpec((C, NS), lambda b: (0, 0)),
                pl.BlockSpec((C, NS), lambda b: (0, 0)),
            ],
            out_specs=pl.BlockSpec((None, C, NS), lambda b: (b, 0, 0)),
        ),
        compiler_params=pltpu.CompilerParams(dimension_semantics=("parallel",)),
    )(x, w_cat, masks, b_col, g, bt)

    return out.reshape(B, C, N, S)                            # free reshape (still NCHW)


# ----------------------------------------------------------------------------
# Pure-JAX references (sanity checks only)
# ----------------------------------------------------------------------------
def _mlp_ref(x, w, b, gamma, beta):
    y = x @ w + b
    mu = jnp.mean(y, axis=-1, keepdims=True)
    var = jnp.mean(jnp.square(y - mu), axis=-1, keepdims=True)
    yn = (y - mu) / jnp.sqrt(var + LN_EPS) * gamma + beta
    return jnp.maximum(yn, 0.0) + x


def _cnn_ref(x_nchw, w_oihw, conv_b, gamma_cns, beta_cns):
    B, C, N, S = x_nchw.shape
    y = lax.conv_general_dilated(
        x_nchw, w_oihw, window_strides=(1, 1), padding="SAME",
        dimension_numbers=("NCHW", "OIHW", "NCHW"),
    ) + conv_b.reshape(1, C, 1, 1)
    mu = jnp.mean(y, axis=(1, 2, 3), keepdims=True)
    var = jnp.mean(jnp.square(y - mu), axis=(1, 2, 3), keepdims=True)
    yn = (y - mu) / jnp.sqrt(var + LN_EPS) * gamma_cns[None] + beta_cns[None]
    return jnp.maximum(yn, 0.0) + x_nchw


# ----------------------------------------------------------------------------
if __name__ == "__main__":
    # hidden_dim=128 (module default) keeps lanes dense; N*S=128 keeps the CNN
    # slab lane-dense as well.
    cfg = ModelConfig(num_nodes=8, seq_len=16, hidden_dim=128)
    B, N, S, H = 2, cfg.num_nodes, cfg.seq_len, cfg.hidden_dim

    key = jax.random.PRNGKey(0)
    ks = jax.random.split(key, 10)

    # ---- mlp variant params + input (x: (B, N, S, H)) ----
    x_mlp = jax.random.normal(ks[0], (B, N, S, H), jnp.float32)
    w_mlp = 0.05 * jax.random.normal(ks[1], (H, H), jnp.float32)
    b_mlp = 0.05 * jax.random.normal(ks[2], (H,), jnp.float32)
    gamma_mlp = 1.0 + 0.05 * jax.random.normal(ks[3], (H,), jnp.float32)
    beta_mlp = 0.05 * jax.random.normal(ks[4], (H,), jnp.float32)

    out_mlp = jax.block_until_ready(
        mlp_spatial_processor(x_mlp, w_mlp, b_mlp, gamma_mlp, beta_mlp))
    ref_mlp = _mlp_ref(x_mlp, w_mlp, b_mlp, gamma_mlp, beta_mlp)
    assert out_mlp.shape == (B, N, S, H)
    assert jnp.allclose(out_mlp, ref_mlp, atol=5e-2, rtol=5e-2)

    # ---- cnn variant params + input (x: NCHW = (B, H, N, S)) ----
    x_cnn = jax.random.normal(ks[5], (B, H, N, S), jnp.float32)
    w_cnn = 0.05 * jax.random.normal(ks[6], (H, H, 3, 3), jnp.float32)  # OIHW
    b_cnn = 0.05 * jax.random.normal(ks[7], (H,), jnp.float32)
    gamma_cnn = 1.0 + 0.05 * jax.random.normal(ks[8], (H, N, S), jnp.float32)
    beta_cnn = 0.05 * jax.random.normal(ks[9], (H, N, S), jnp.float32)

    out_cnn = jax.block_until_ready(
        cnn_spatial_processor(x_cnn, w_cnn, b_cnn, gamma_cnn, beta_cnn))
    ref_cnn = _cnn_ref(x_cnn, w_cnn, b_cnn, gamma_cnn, beta_cnn)
    assert out_cnn.shape == (B, H, N, S)
    assert jnp.allclose(out_cnn, ref_cnn, atol=5e-2, rtol=5e-2)

    print("KERNEL_OK")
</pallas_src>

<mosaic_0001>
module attributes {stable_mosaic.version = 11 : i64} {
  func.func @_mlp_kernel(%arg0: i32, %arg1: memref<128x128xf32, #tpu.memory_space<vmem>>, %arg2: memref<128x128xbf16, #tpu.memory_space<vmem>>, %arg3: memref<1x128xf32, #tpu.memory_space<vmem>>, %arg4: memref<1x128xf32, #tpu.memory_space<vmem>>, %arg5: memref<1x128xf32, #tpu.memory_space<vmem>>, %arg6: memref<128x128xf32, #tpu.memory_space<vmem>>) attributes {dimension_semantics = [#tpu.dimension_semantics<parallel>], iteration_bounds = array<i64: 2>, scalar_prefetch = 0 : i64, scratch_operands = 0 : i64, tpu.core_type = #tpu.core_type<tc>, window_params = [{transform_indices = @transform_0, window_bounds = array<i64: 128, 128>}, {pipeline_mode = #tpu.pipeline_mode<synchronous>, transform_indices = @transform_1, window_bounds = array<i64: 128, 128>}, {pipeline_mode = #tpu.pipeline_mode<synchronous>, transform_indices = @transform_2, window_bounds = array<i64: 1, 128>}, {pipeline_mode = #tpu.pipeline_mode<synchronous>, transform_indices = @transform_3, window_bounds = array<i64: 1, 128>}, {pipeline_mode = #tpu.pipeline_mode<synchronous>, transform_indices = @transform_4, window_bounds = array<i64: 1, 128>}, {transform_indices = @transform_5, window_bounds = array<i64: 128, 128>}]} {
    %c0 = arith.constant 0 : index
    %c0_0 = arith.constant 0 : index
    %0 = vector.load %arg1[%c0, %c0_0] : memref<128x128xf32, #tpu.memory_space<vmem>>, vector<128x128xf32>
    %1 = arith.truncf %0 : vector<128x128xf32> to vector<128x128xbf16>
    %c0_1 = arith.constant 0 : index
    %c0_2 = arith.constant 0 : index
    %2 = vector.load %arg2[%c0_1, %c0_2] : memref<128x128xbf16, #tpu.memory_space<vmem>>, vector<128x128xbf16>
    %cst = arith.constant dense<0.000000e+00> : vector<128x128xf32>
    %3 = tpu.matmul %1, %2, %cst {dimension_numbers = #tpu.dot_dimension_numbers<[1], [0], [0], [1], [0, 0, 1, 1], [], []>} : vector<128x128xbf16>, vector<128x128xbf16>, vector<128x128xf32> -> vector<128x128xf32>
    %c0_3 = arith.constant 0 : index
    %c0_4 = arith.constant 0 : index
    %4 = vector.load %arg3[%c0_3, %c0_4] : memref<1x128xf32, #tpu.memory_space<vmem>>, vector<1x128xf32>
    %5 = vector.broadcast %4 : vector<1x128xf32> to vector<128x128xf32>
    %6 = arith.addf %3, %5 : vector<128x128xf32>
    %cst_5 = arith.constant dense<0.000000e+00> : vector<128xf32>
    %7 = vector.multi_reduction <add>, %6, %cst_5 [1] : vector<128x128xf32> to vector<128xf32>
    %8 = vector.shape_cast %7 : vector<128xf32> to vector<128x1xf32>
    %cst_6 = arith.constant 1.280000e+02 : f32
    %9 = vector.broadcast %cst_6 : f32 to vector<128x1xf32>
    %10 = arith.divf %8, %9 : vector<128x1xf32>
    %11 = vector.broadcast %10 : vector<128x1xf32> to vector<128x128xf32>
    %12 = arith.subf %6, %11 : vector<128x128xf32>
    %13 = arith.mulf %12, %12 : vector<128x128xf32>
    %cst_7 = arith.constant dense<0.000000e+00> : vector<128xf32>
    %14 = vector.multi_reduction <add>, %13, %cst_7 [1] : vector<128x128xf32> to vector<128xf32>
    %15 = vector.shape_cast %14 : vector<128xf32> to vector<128x1xf32>
    %cst_8 = arith.constant 1.280000e+02 : f32
    %16 = vector.broadcast %cst_8 : f32 to vector<128x1xf32>
    %17 = arith.divf %15, %16 : vector<128x1xf32>
    %18 = vector.broadcast %10 : vector<128x1xf32> to vector<128x128xf32>
    %19 = arith.subf %6, %18 : vector<128x128xf32>
    %cst_9 = arith.constant 9.99999974E-6 : f32
    %20 = vector.broadcast %cst_9 : f32 to vector<128x1xf32>
    %21 = arith.addf %17, %20 : vector<128x1xf32>
    %22 = math.rsqrt %21 : vector<128x1xf32>
    %23 = vector.broadcast %22 : vector<128x1xf32> to vector<128x128xf32>
    %24 = arith.mulf %19, %23 : vector<128x128xf32>
    %c0_10 = arith.constant 0 : index
    %c0_11 = arith.constant 0 : index
    %25 = vector.load %arg4[%c0_10, %c0_11] : memref<1x128xf32, #tpu.memory_space<vmem>>, vector<1x128xf32>
    %26 = vector.broadcast %25 : vector<1x128xf32> to vector<128x128xf32>
    %27 = arith.mulf %24, %26 : vector<128x128xf32>
    %c0_12 = arith.constant 0 : index
    %c0_13 = arith.constant 0 : index
    %28 = vector.load %arg5[%c0_12, %c0_13] : memref<1x128xf32, #tpu.memory_space<vmem>>, vector<1x128xf32>
    %29 = vector.broadcast %28 : vector<1x128xf32> to vector<128x128xf32>
    %30 = arith.addf %27, %29 : vector<128x128xf32>
    %cst_14 = arith.constant 0.000000e+00 : f32
    %31 = vector.broadcast %cst_14 : f32 to vector<128x128xf32>
    %32 = arith.maximumf %30, %31 : vector<128x128xf32>
    %33 = arith.addf %32, %0 : vector<128x128xf32>
    %c0_15 = arith.constant 0 : index
    %c0_16 = arith.constant 0 : index
    %34 = vector.load %arg6[%c0_15, %c0_16] : memref<128x128xf32, #tpu.memory_space<vmem>>, vector<128x128xf32>
    tpu.vector_store %arg6[%c0_15, %c0_16], %33 {strides = array<i32>} : memref<128x128xf32, #tpu.memory_space<vmem>>, vector<128x128xf32>,
    return
  }
  func.func @transform_0(%arg0: i32) -> (i32, i32) {
    %c0_i32 = arith.constant 0 : i32
    %c0_i32_0 = arith.constant 0 : i32
    return %arg0, %c0_i32 : i32, i32
  }
  func.func @transform_1(%arg0: i32) -> (i32, i32) {
    %c0_i32 = arith.constant 0 : i32
    %c0_i32_0 = arith.constant 0 : i32
    %c0_i32_1 = arith.constant 0 : i32
    return %c0_i32, %c0_i32_0 : i32, i32
  }
  func.func @transform_2(%arg0: i32) -> (i32, i32) {
    %c0_i32 = arith.constant 0 : i32
    %c0_i32_0 = arith.constant 0 : i32
    %c0_i32_1 = arith.constant 0 : i32
    return %c0_i32, %c0_i32_0 : i32, i32
  }
  func.func @transform_3(%arg0: i32) -> (i32, i32) {
    %c0_i32 = arith.constant 0 : i32
    %c0_i32_0 = arith.constant 0 : i32
    %c0_i32_1 = arith.constant 0 : i32
    return %c0_i32, %c0_i32_0 : i32, i32
  }
  func.func @transform_4(%arg0: i32) -> (i32, i32) {
    %c0_i32 = arith.constant 0 : i32
    %c0_i32_0 = arith.constant 0 : i32
    %c0_i32_1 = arith.constant 0 : i32
    return %c0_i32, %c0_i32_0 : i32, i32
  }
  func.func @transform_5(%arg0: i32) -> (i32, i32) {
    %c0_i32 = arith.constant 0 : i32
    %c0_i32_0 = arith.constant 0 : i32
    return %arg0, %c0_i32 : i32, i32
  }
}

</mosaic_0001>

<bundles_post_ra>
// kernel: tpu_custom_call.1
= control target key start
LH: loop header
LB: loop body
LE: loop exit
PB: predicated region body
PF: predicated region fallthrough
CT: control target
= control target key end

     0   :  { %10 = vsyncpa [#allocation3], 0  ;;  %s1637_s0 = inlined_call_operand.hbm [shape: f32[256,128], index: 0, kind: input, shape index: {}]   ;;  %s1638_s1 = inlined_call_operand.hbm [shape: bf16[128,128], index: 1, kind: input, shape index: {}]   ;;  %s1639_s2 = inlined_call_operand.vmem [shape: f32[1,128], index: 2, kind: input, shape index: {}]   ;;  %s1640_s3 = inlined_call_operand.vmem [shape: f32[1,128], index: 3, kind: input, shape index: {}]   ;;  %s1641_s4 = inlined_call_operand.vmem [shape: f32[1,128], index: 4, kind: input, shape index: {}]   ;;  %s1642_s5 = inlined_call_operand.hbm [shape: f32[256,128], index: 5, kind: output, shape index: {}]  }
   0x1   :  { %12 = vsyncpa [#allocation3 + $0x1], 0 }
   0x2   :  { %13 = vsyncpa [#allocation6], 0 }
   0x3   :  { %14 = vsyncpa [#allocation4], 0 }
   0x4   :  { %16 = vsyncpa [#allocation4 + $0x1], 0  ;;  %s1186_s18 = smov 0   ;;  %s1188_s19 = smov 0  }
   0x5   :  { %s1190_s20 = smov 0   ;;  %s1192_s21 = smov 0  }
   0x6 LB: > { %s1207_s22 = sadd.s32 4294967295, %s1145_s21   ;;  %s821_s23 = sadd.s32 4294967294, %s1145_s21   ;;  %s1145_s21 = sphi %s1192_s21, %s1662_s21   ;;  %s1141_s20 = sphi %s1190_s20, %s1661_s20   ;;  %s1137_s19 = sphi %s1188_s19, %s1660_s19   ;;  %s1133_s18 = sphi %s1186_s18, %s1659_s18  }
   0x7   : > { %p42_p0 = scmp.ne.s32.totalorder %s1137_s19, %s1133_s18  ;;  %p1643_p1 = scmp.eq.s32.totalorder %s1207_s22, 0 }
   0x8   : > { %p156_p3 = scmp.eq.s32.totalorder %s821_s23, 1  ;;  %p822_p5 = scmp.ge.s32.totalorder %s1145_s21, 1 }
   0x9   : > { %p1216_p4 = por %p1643_p1, %p42_p0  ;;  %p163_p7 = scmp.lt.s32.totalorder %s1145_s21, 3 }
   0xa   : > { %p1221_p6 = por %p156_p3, %p42_p0  ;;  %s1147_s27 = smov [#allocation5]  }
   0xb   : > { %s1646_s24 = scalar_select %p1216_p4, 1, 0 }
   0xc   : > { %s1647_s25 = scalar_select %p1221_p6, 1, 0 }
   0xd   : > { %p1226_p8 = pnand %p822_p5, %p163_p7  ;;  %s175_s28 = sshll.u32 %s1147_s27, 4  ;;  %s1230_s28 = int_to_ptr.vmem [resolvable:$true] %s175_s28 }
   0xe   : > { %s1242_s30 = sadd.s32 1, %s1145_s21   ;;  %s29_s6 = sadd.s32 1, %s1141_s20 }
   0xf   : > { %s1648_s26 = scalar_select %p1226_p8, 1, 0 }
  0x10   : > { %p922_p9 = pneg %p1226_p8  ;;  %s26_s7 = ssub.s32 %s1145_s21, %s1242_s30 }
  0x11   : > { %s1017_s10 = scalar_lea.hbm %s1638_s1, 1024 }
  0x12   : > { %p1237_p11 = pnand %p922_p9, %p1643_p1  ;;  %p1018_p12 = scmp.ne.s32.totalorder %s1638_s1, %s1017_s10 }
  0x13   : > { %p1024_p5 = scmp.lt.u32.totalorder %s1017_s10, %s1638_s1 }
  0x14   : > { %p1019_p13 = pneg %p1237_p11 }
  0x16   : > { %p1020_p0 = pnand %p1019_p13, %p1018_p12 }
  0x18   : > { %p1021_p3 = pneg %p1020_p0 }
  0x1a   : > { %p1026_p7 = pnand %p1024_p5, %p1021_p3 }
  0x1c   : > { %1029 = shalt.err (!%p1026_p7)
}
  0x1d   : > { %s1030_s15 = scalar_lea.vmem %s1230_s28, 1024  ;;  %p1038_p2 = scmp.lt.s32.totalorder %s1230_s28, %s1230_s28 }
  0x1e   : > { %p1031_p9 = scmp.ne.s32.totalorder %s1230_s28, %s1030_s15  ;;  %p1039_p6 = scmp.lt.s32.totalorder %s1030_s15, %s1030_s15 }
  0x20   : > { %p1033_p10 = pnand %p1031_p9, %p1019_p13  ;;  %p1040_p4 = por %p1039_p6, %p1038_p2 }
  0x22   : > { %p1034_p1 = pneg %p1033_p10 }
  0x24   : > { %p1041_p8 = pnand %p1040_p4, %p1034_p1 }
  0x26   : > { %1044 = shalt.err (!%p1041_p8)
}
  0x27   : > { %s1148_s16 = smov 64   ;;  %s1149_s17 = smov 4  }
  0x28   : > { %925 = dma.hbm_to_vmem [thread:$0]  (!%p1237_p11), %s1638_s1, 1024, %s1230_s28, [#allocation6], %s1148_s16, %s1148_s16, %s1149_s17  }
  0x29   : > { %p27_p2 = scmp.eq.s32.totalorder %s26_s7, 0  ;;  %p36_p1 = scmp.ne.s32.totalorder %s1141_s20, %s1137_s19 }
  0x2a   : > { %p37_p4 = scmp.eq.s32.totalorder %s1145_s21, 0  ;;  %p935_p6 = scmp.lt.s32.totalorder %s1145_s21, 2 }
  0x2b   : > { %s1273_s8 = scalar_select %p27_p2, %s1141_s20, %s29_s6  }
  0x2c   : > { %p38_p8 = por %p37_p4, %p36_p1  ;;  %p1650_p10 = scmp.eq.s32.totalorder %s1207_s22, 1 }
  0x2d   : > { %s198_s10 = sand.u32 1, %s1141_s20   ;;  %s848_s11 = sshll.u32 %s1145_s21, 11 }
  0x2e   : > { %p1277_p12 = por %p1650_p10, %p36_p1  ;;  %s825_s12 = sshll.u32 %s198_s10, 7 }
  0x2f   : > { %s1286_s14 = scalar_lea.hbm %s1637_s0, %s848_s11  ;;  %s202_s28 = scalar_lea.vmem [#allocation2], %s825_s12 }
  0x30   : > { %s209_s6 = sshll.u32 %s202_s28, 4  ;;  %p1288_p11 = pnand %p935_p6, %p38_p8  ;;  %s1292_s6 = int_to_ptr.vmem [resolvable:$true] %s209_s6 }
  0x31   : > { %s1294_s15 = scalar_lea.sflag [#allocation3], %s198_s10  ;;  %s1045_s16 = scalar_lea.hbm %s1286_s14, 2048 }
  0x32   : > { %p1046_p13 = scmp.ne.s32.totalorder %s1286_s14, %s1045_s16  ;;  %p1047_p0 = pneg %p1288_p11 }
  0x33   : > { %s1050_s27 = scalar_lea.hbm %s1637_s0, 4096  ;;  %p1051_p7 = scmp.lt.u32.totalorder %s1286_s14, %s1637_s0 }
  0x34   : > { %p1048_p3 = pnand %p1047_p0, %p1046_p13  ;;  %p1052_p9 = scmp.lt.u32.totalorder %s1050_s27, %s1045_s16 }
  0x35   : > { %p1054_p1 = scmp.lt.u32.totalorder %s1045_s16, %s1286_s14 }
  0x36   : > { %p1049_p5 = pneg %p1048_p3  ;;  %p1053_p2 = por %p1052_p9, %p1051_p7 }
  0x38   : > { %p1055_p4 = por %p1054_p1, %p1053_p2 }
  0x3a   : > { %p1056_p6 = pnand %p1055_p4, %p1049_p5 }
  0x3c   : > { %1059 = shalt.err (!%p1056_p6)
}
  0x3d   : > { %s1060_s10 = scalar_lea.vmem %s1292_s6, 2048  ;;  %s1150_s29 = smov [#allocation2]  }
  0x3e   : > { %p1061_p8 = scmp.ne.s32.totalorder %s1292_s6, %s1060_s10  ;;  %s1065_s13 = sshll.u32 %s1150_s29, 4  ;;  %s1066_s13 = int_to_ptr.vmem [resolvable:$false] %s1065_s13 }
  0x3f   : > { %s1067_s28 = scalar_lea.vmem %s1066_s13, 4096  ;;  %p1068_p3 = scmp.lt.s32.totalorder %s1292_s6, %s1066_s13 }
  0x40   : > { %p1063_p10 = pnand %p1061_p8, %p1047_p0  ;;  %p1069_p7 = scmp.lt.s32.totalorder %s1067_s28, %s1060_s10 }
  0x42   : > { %p1064_p13 = pneg %p1063_p10  ;;  %p1070_p9 = por %p1069_p7, %p1068_p3 }
  0x44   : > { %p1071_p2 = pnand %p1070_p9, %p1064_p13 }
  0x46   : > { %1074 = shalt.err (!%p1071_p2)
}
  0x47   : > { %s1151_s16 = smov 128   ;;  %s1152_s17 = smov 8  }
  0x48   : > { %929 = dma.hbm_to_vmem [thread:$0]  (!%p1288_p11), %s1286_s14, 2048, %s1292_s6, %s1294_s15, %s1151_s16, %s1151_s16, %s1152_s17  }
  0x49   : > { %p1653_p0 = scmp.ne.s32.totalorder %s1648_s26, 0 }
  0x4a   : > { %s1325_s23 = sand.u32 (!%p1653_p0), 1, %s1137_s19   ;;  %p1654_p5 = scmp.ne.s32.totalorder (!%p1653_p0), %s1646_s24, 0 }
  0x4b   : > { %221 = sbr.rel (%p1653_p0) target bundleno = 696 (0x2b8), region = 40  ;;  %s829_s27 = sshll.u32 (!%p1653_p0), %s1325_s23, 7 }
  0x4c   : > { %s224_s11 = scalar_lea.sflag (!%p1653_p0), [#allocation3], %s1325_s23  ;;  %s1331_s12 = scalar_lea.vmem (!%p1653_p0), [#allocation2], %s829_s27 }
  0x52   : > { %1120 = dma.done.wait (%p1654_p5), %s224_s11, 2048  }
  0x53   : > { %1122 = vsyncadd (%p1654_p5), %s224_s11, 4294965248  ;;  %p1655_p11 = scmp.eq.s32.totalorder %s1207_s22, 0 }
  0x55   : > { %1124 = dma.done.wait (%p1655_p11), [#allocation6], 1024   ;;  %p1656_p1 = pmov %p1655_p11 }
  0x56   : > { %v977_v0 = vld [vmem:[#allocation5] sm:$0xff]   ;;  %v978_v1 = vld [vmem:[#allocation5 + $0x8] sm:$0xff]   ;;  %v979_v2 = vld [vmem:[#allocation5 + $0x10] sm:$0xff]   ;;  %s1516_s10 = scalar_lea.vmem [#allocation7], %s829_s27  ;;  %s849_s29 = sshll.u32 %s1207_s22, 11 }
  0x57   : > { %1126 = vsyncadd (%p1656_p1), [#allocation6], 4294966272  ;;  %866 = vmatprep.subr.bf16.mxu0 %v977_v0  ;;  %898 = vmatprep.subr.bf16.mxu1 %v977_v0  ;;  %v980_v3 = vld [vmem:[#allocation5 + $0x18] sm:$0xff]   ;;  %v1342_v4 = vld [vmem:[%s1331_s12] sm:$0xff]  ;;  %s738_s13 = sshll.u32 %s1516_s10, 4  ;;  %s1589_s17 = scalar_lea.hbm %s1642_s5, %s849_s29  ;;  %s1591_s13 = int_to_ptr.vmem [resolvable:$true] %s738_s13 }
  0x58   : > { %867 = vmatpush3.bf16.msra.mxu0 %v977_v0  ;;  %906 = vmatpush3.bf16.msra.mxu1 %v977_v0  ;;  %v1345_v5 = vld [vmem:[%s1331_s12 + $0x8] sm:$0xff]  ;;  %v1348_v6 = vld [vmem:[%s1331_s12 + $0x40] sm:$0xff]  ;;  %v983_v12 = vld [vmem:[#allocation5 + $0x30] sm:$0xff]   ;;  %s725_s22 = scalar_lea.sflag [#allocation4], %s1325_s23  ;;  %s1075_s27 = scalar_lea.vmem %s1591_s13, 2048 }
  0x59   : > { %868 = vmatprep.subr.bf16.mxu0 %v978_v1  ;;  %899 = vmatprep.subr.bf16.mxu1 %v978_v1  ;;  %v277_v7 = vpack.c.bf16 %v1345_v5, %v1342_v4  ;;  %v1353_v8 = vld [vmem:[%s1331_s12 + $0x48] sm:$0xff]  ;;  %v981_v10 = vld [vmem:[#allocation5 + $0x20] sm:$0xff]   ;;  %v984_v13 = vld [vmem:[#allocation5 + $0x38] sm:$0xff]   ;;  %p1076_p4 = scmp.ne.s32.totalorder %s1591_s13, %s1075_s27  ;;  %s1153_s11 = smov [#allocation7]  }
  0x5a   : > { %v281_v9 = vpack.c.bf16 %v1353_v8, %v1348_v6  ;;  %v982_v11 = vld [vmem:[#allocation5 + $0x28] sm:$0xff]   ;;  %v1358_v14 = vld [vmem:[%s1331_s12 + $0x10] sm:$0xff]  ;;  %v1361_v15 = vld [vmem:[%s1331_s12 + $0x18] sm:$0xff] }
  0x5b   : > { %882 = vmatprep.mubr.bf16.mxu0 %v277_v7  ;;  %v1364_v16 = vld [vmem:[%s1331_s12 + $0x50] sm:$0xff]  ;;  %v1367_v17 = vld [vmem:[%s1331_s12 + $0x58] sm:$0xff]  ;;  %v1370_v18 = vld [vmem:[%s1331_s12 + $0x20] sm:$0xff]  ;;  %v278_v22 = vpack.c.bf16 %v1361_v15, %v1358_v14  ;;  %p1077_p6 = pnand %p1076_p4, %p1277_p12 }
  0x5c   : > { %869 = vmatpush3.bf16.msra.mxu0 %v978_v1  ;;  %907 = vmatpush3.bf16.msra.mxu1 %v978_v1  ;;  %v1373_v19 = vld [vmem:[%s1331_s12 + $0x28] sm:$0xff]  ;;  %v1376_v20 = vld [vmem:[%s1331_s12 + $0x60] sm:$0xff]  ;;  %v282_v23 = vpack.c.bf16 %v1367_v17, %v1364_v16  ;;  %v1390_v26 = vld [vmem:[%s1331_s12 + $0x30] sm:$0xff] }
  0x5d   : > { %870 = vmatprep.subr.bf16.mxu0 %v979_v2  ;;  %900 = vmatprep.subr.bf16.mxu1 %v979_v2  ;;  %v1379_v21 = vld [vmem:[%s1331_s12 + $0x68] sm:$0xff]  ;;  %v279_v24 = vpack.c.bf16 %v1373_v19, %v1370_v18  ;;  %v1393_v27 = vld [vmem:[%s1331_s12 + $0x38] sm:$0xff]  ;;  %v1396_v28 = vld [vmem:[%s1331_s12 + $0x70] sm:$0xff]  ;;  %p1078_p8 = pneg %p1077_p6 }
  0x5e   : > { %890 = vmatprep.mubr.bf16.mxu1 %v281_v9  ;;  %v283_v25 = vpack.c.bf16 %v1379_v21, %v1376_v20  ;;  %v1399_v29 = vld [vmem:[%s1331_s12 + $0x78] sm:$0xff]  ;;  %v280_v30 = vpack.c.bf16 %v1393_v27, %v1390_v26  ;;  %v832_v32 = vld [vmem:[%s1639_s2] ss:$0 sm:$0xff]  ;;  %s1079_s12 = sshll.u32 %s1153_s11, 4  ;;  %s1080_s12 = int_to_ptr.vmem [resolvable:$false] %s1079_s12 }
  0x5f   : > { %v284_v31 = vpack.c.bf16 %v1399_v29, %v1396_v28  ;;  %s1081_s24 = scalar_lea.vmem %s1080_s12, 4096  ;;  %p1082_p10 = scmp.lt.s32.totalorder %s1591_s13, %s1080_s12 }
  0x60   : > { %871 = vmatpush3.bf16.msra.mxu0 %v979_v2  ;;  %908 = vmatpush3.bf16.msra.mxu1 %v979_v2  ;;  %p1083_p13 = scmp.lt.s32.totalorder %s1081_s24, %s1075_s27 }
  0x61   : > { %872 = vmatprep.subr.bf16.mxu0 %v980_v3  ;;  %901 = vmatprep.subr.bf16.mxu1 %v980_v3 }
  0x62   : > { %p1084_p3 = por %p1083_p13, %p1082_p10 }
  0x64   : > { %873 = vmatpush3.bf16.msra.mxu0 %v980_v3  ;;  %909 = vmatpush3.bf16.msra.mxu1 %v980_v3  ;;  %p1085_p7 = pnand %p1084_p3, %p1078_p8 }
  0x65   : > { %874 = vmatprep.subr.bf16.mxu0 %v981_v10  ;;  %902 = vmatprep.subr.bf16.mxu1 %v981_v10 }
  0x68   : > { %875 = vmatpush3.bf16.msra.mxu0 %v981_v10  ;;  %910 = vmatpush3.bf16.msra.mxu1 %v981_v10 }
  0x69   : > { %876 = vmatprep.subr.bf16.mxu0 %v982_v11  ;;  %903 = vmatprep.subr.bf16.mxu1 %v982_v11 }
  0x6c   : > { %877 = vmatpush3.bf16.msra.mxu0 %v982_v11  ;;  %911 = vmatpush3.bf16.msra.mxu1 %v982_v11 }
  0x6d   : > { %878 = vmatprep.subr.bf16.mxu0 %v983_v12  ;;  %904 = vmatprep.subr.bf16.mxu1 %v983_v12 }
  0x70   : > { %879 = vmatpush3.bf16.msra.mxu0 %v983_v12  ;;  %912 = vmatpush3.bf16.msra.mxu1 %v983_v12 }
  0x71   : > { %880 = vmatprep.subr.bf16.mxu0 %v984_v13  ;;  %905 = vmatprep.subr.bf16.mxu1 %v984_v13 }
  0x74   : > { %881 = vmatpush3.bf16.msra.mxu0 %v984_v13  ;;  %913 = vmatpush3.bf16.msra.mxu1 %v984_v13 }
  0x77   : > { %883 = vmatmul.mubr.bf16.vlgmr.msra.gmra.mrb[0].mxu0 %v278_v22  ;;  %891 = vmatmul.mubr.bf16.vlgmr.msra.gmra.mrb[0].mxu1 %v282_v23 }
  0x78   : > { %886 = vmatprep.mubr.bf16.mxu0 %v279_v24  ;;  %894 = vmatprep.mubr.bf16.mxu1 %v283_v25 }
  0x7f   : > { %887 = vmatmul.mubr.bf16.gmra.mrb[4].mxu0 %v280_v30  ;;  %895 = vmatmul.mubr.bf16.gmra.mrb[4].mxu1 %v284_v31 }
 0x14a   : > { %v884_v33 = vpop.f32.mrb[0].mxu0  ;;  %v892_v34 = vpop.f32.mrb[0].mxu1 }
 0x14b   : > { %v399_v35 = vadd.f32 %v884_v33, %v832_v32  ;;  %v431_v36 = vadd.f32 %v892_v34, %v832_v32  ;;  %v390_v37 = vpop.f32.mrb[1].mxu0  ;;  %v422_v38 = vpop.f32.mrb[1].mxu1 }
 0x14c   : > { %v885_v39 = vpop.f32.mrb[2].mxu0  ;;  %v893_v40 = vpop.f32.mrb[2].mxu1  ;;  %v391_v43 = vadd.f32 %v832_v32, %v390_v37  ;;  %v423_v47 = vadd.f32 %v832_v32, %v422_v38 }
 0x14d   : > { %473 = vadd.xlane.f32.xlu0 %v431_v36  ;;  %v425_v41 = vpop.f32.mrb[3].mxu1  ;;  %457 = vadd.xlane.f32.xlu1 %v399_v35  ;;  %v393_v42 = vpop.f32.mrb[3].mxu0  ;;  %v402_v44 = vadd.f32 %v885_v39, %v832_v32  ;;  %v434_v48 = vadd.f32 %v893_v40, %v832_v32 }
 0x14e   : > { %v426_v55 = vadd.f32 %v832_v32, %v425_v41  ;;  %v394_v56 = vadd.f32 %v832_v32, %v393_v42 }
 0x151   : > { %459 = vadd.xlane.f32.xlu1 %v402_v44  ;;  %453 = vadd.xlane.f32.xlu0 %v391_v43 }
 0x152   : > { %v888_v45 = vpop.f32.mrb[4].mxu0  ;;  %v896_v46 = vpop.f32.mrb[4].mxu1 }
 0x153   : > { %v406_v49 = vpop.f32.mrb[5].mxu0  ;;  %v438_v50 = vpop.f32.mrb[5].mxu1  ;;  %v415_v57 = vadd.f32 %v888_v45, %v832_v32  ;;  %v1417_v63 = vadd.f32 %v896_v46, %v832_v32 }
 0x154   : > { %v889_v51 = vpop.f32.mrb[6].mxu0  ;;  %v897_v52 = vpop.f32.mrb[6].mxu1  ;;  %v407_v59 = vadd.f32 %v832_v32, %v406_v49  ;;  %v1410_v61 = vadd.f32 %v832_v32, %v438_v50 }
 0x155   : > { %475 = vadd.xlane.f32.xlu1 %v434_v48  ;;  %469 = vadd.xlane.f32.xlu0 %v423_v47  ;;  %v409_v53 = vpop.f32.mrb[7].mxu0  ;;  %v441_v54 = vpop.f32.mrb[7].mxu1  ;;  %v418_v58 = vadd.f32 %v889_v51, %v832_v32  ;;  %v1419_v0 = vadd.f32 %v897_v52, %v832_v32 }
 0x156   : > { %v1408_v60 = vadd.f32 %v832_v32, %v409_v53  ;;  %v1413_v62 = vadd.f32 %v832_v32, %v441_v54 }
 0x159   : > { %471 = vadd.xlane.f32.xlu1 %v426_v55  ;;  %455 = vadd.xlane.f32.xlu0 %v394_v56 }
 0x15d   : > { %467 = vadd.xlane.f32.xlu1 %v418_v58  ;;  %465 = vadd.xlane.f32.xlu0 %v415_v57 }
 0x161   : > { %463 = vadd.xlane.f32.xlu1 %v1408_v60  ;;  %461 = vadd.xlane.f32.xlu0 %v407_v59 }
 0x165   : > { %479 = vadd.xlane.f32.xlu1 %v1413_v62  ;;  %477 = vadd.xlane.f32.xlu0 %v1410_v61 }
 0x169   : > { %483 = vadd.xlane.f32.xlu1 %v1419_v0  ;;  %481 = vadd.xlane.f32.xlu0 %v1417_v63 }
 0x1da   : > { %v474_v1 = vpop.xlane.xlu0 %473  ;;  %v458_v2 = vpop.xlane.xlu1 %457 }
 0x1db   : > { %v496_v3 = vmul.f32 0.0078125, %v474_v1  ;;  %v488_v7 = vmul.f32 0.0078125, %v458_v2 }
 0x1dd   : > { %v1423_v9 = vsub.f32 %v399_v35, %v488_v7  ;;  %v1425_v12 = vsub.f32 %v431_v36, %v496_v3 }
 0x1de   : > { %v460_v10 = vpop.xlane.xlu1 %459  ;;  %v454_v11 = vpop.xlane.xlu0 %453 }
 0x1df   : > { %v489_v13 = vmul.f32 0.0078125, %v460_v10  ;;  %v486_v22 = vmul.f32 0.0078125, %v454_v11  ;;  %v520_v23 = vmul.f32 %v1423_v9, %v1423_v9  ;;  %v528_v35 = vmul.f32 %v1425_v12, %v1425_v12 }
 0x1e1   : > { %v1429_v24 = vsub.f32 %v402_v44, %v489_v13  ;;  %538 = vadd.xlane.f32.xlu0 %v520_v23  ;;  %v1431_v25 = vsub.f32 %v391_v43, %v486_v22 }
 0x1e2   : > { %v476_v30 = vpop.xlane.xlu1 %475  ;;  %v470_v31 = vpop.xlane.xlu0 %469 }
 0x1e3   : > { %v497_v32 = vmul.f32 0.0078125, %v476_v30  ;;  %v494_v33 = vmul.f32 0.0078125, %v470_v31  ;;  %v521_v34 = vmul.f32 %v1429_v24, %v1429_v24  ;;  %v518_v39 = vmul.f32 %v1431_v25, %v1431_v25 }
 0x1e5   : > { %v1437_v36 = vsub.f32 %v434_v48, %v497_v32  ;;  %540 = vadd.xlane.f32.xlu1 %v521_v34  ;;  %554 = vadd.xlane.f32.xlu0 %v528_v35  ;;  %v1441_v40 = vsub.f32 %v423_v47, %v494_v33 }
 0x1e6   : > { %v472_v37 = vpop.xlane.xlu1 %471  ;;  %v456_v38 = vpop.xlane.xlu0 %455 }
 0x1e7   : > { %v495_v41 = vmul.f32 0.0078125, %v472_v37  ;;  %v487_v42 = vmul.f32 0.0078125, %v456_v38  ;;  %v529_v43 = vmul.f32 %v1437_v36, %v1437_v36  ;;  %v526_v51 = vmul.f32 %v1441_v40, %v1441_v40 }
 0x1e9   : > { %v1445_v44 = vsub.f32 %v394_v56, %v487_v42  ;;  %556 = vadd.xlane.f32.xlu1 %v529_v43  ;;  %534 = vadd.xlane.f32.xlu0 %v518_v39  ;;  %v1447_v45 = vsub.f32 %v426_v55, %v495_v41 }
 0x1ea   : > { %v468_v46 = vpop.xlane.xlu1 %467  ;;  %v466_v48 = vpop.xlane.xlu0 %465 }
 0x1eb   : > { %v493_v49 = vmul.f32 0.0078125, %v468_v46  ;;  %v492_v50 = vmul.f32 0.0078125, %v466_v48  ;;  %v519_v47 = vmul.f32 %v1445_v44, %v1445_v44  ;;  %v527_v55 = vmul.f32 %v1447_v45, %v1447_v45 }
 0x1ed   : > { %v1453_v52 = vsub.f32 %v415_v57, %v492_v50  ;;  %550 = vadd.xlane.f32.xlu0 %v526_v51  ;;  %536 = vadd.xlane.f32.xlu1 %v519_v47  ;;  %v1457_v56 = vsub.f32 %v418_v58, %v493_v49 }
 0x1ee   : > { %v464_v53 = vpop.xlane.xlu1 %463  ;;  %v462_v54 = vpop.xlane.xlu0 %461 }
 0x1ef   : > { %v491_v1 = vmul.f32 0.0078125, %v464_v53  ;;  %v490_v2 = vmul.f32 0.0078125, %v462_v54  ;;  %v524_v3 = vmul.f32 %v1453_v52, %v1453_v52  ;;  %v525_v58 = vmul.f32 %v1457_v56, %v1457_v56 }
 0x1f1   : > { %v1461_v7 = vsub.f32 %v407_v59, %v490_v2  ;;  %552 = vadd.xlane.f32.xlu1 %v527_v55  ;;  %546 = vadd.xlane.f32.xlu0 %v524_v3  ;;  %v1464_v57 = vsub.f32 %v1408_v60, %v491_v1 }
 0x1f2   : > { %v480_v10 = vpop.xlane.xlu1 %479  ;;  %v478_v11 = vpop.xlane.xlu0 %477 }
 0x1f3   : > { %v499_v13 = vmul.f32 0.0078125, %v480_v10  ;;  %v498_v22 = vmul.f32 0.0078125, %v478_v11  ;;  %v522_v23 = vmul.f32 %v1461_v7, %v1461_v7  ;;  %v523_v60 = vmul.f32 %v1464_v57, %v1464_v57 }
 0x1f5   : > { %v1471_v30 = vsub.f32 %v1410_v61, %v498_v22  ;;  %548 = vadd.xlane.f32.xlu1 %v525_v58  ;;  %542 = vadd.xlane.f32.xlu0 %v522_v23  ;;  %v1476_v32 = vsub.f32 %v1413_v62, %v499_v13  ;;  %v1495_v22 = vld [vmem:[%s1640_s3] ss:$0 sm:$0xff] }
 0x1f6   : > { %v484_v59 = vpop.xlane.xlu1 %483  ;;  %v482_v31 = vpop.xlane.xlu0 %481 }
 0x1f7   : > { %v501_v33 = vmul.f32 0.0078125, %v484_v59  ;;  %v500_v34 = vmul.f32 0.0078125, %v482_v31  ;;  %v530_v35 = vmul.f32 %v1471_v30, %v1471_v30  ;;  %v531_v38 = vmul.f32 %v1476_v32, %v1476_v32 }
 0x1f9   : > { %v1481_v37 = vsub.f32 %v1417_v63, %v500_v34  ;;  %544 = vadd.xlane.f32.xlu1 %v523_v60  ;;  %558 = vadd.xlane.f32.xlu0 %v530_v35  ;;  %v1484_v61 = vsub.f32 %v1419_v0, %v501_v33  ;;  %v1501_v33 = vld [vmem:[%s1641_s4] ss:$0 sm:$0xff] }
 0x1fb   : > { %v532_v62 = vmul.f32 %v1481_v37, %v1481_v37  ;;  %v533_v39 = vmul.f32 %v1484_v61, %v1484_v61 }
 0x1fd   : > { %560 = vadd.xlane.f32.xlu1 %v531_v38  ;;  %562 = vadd.xlane.f32.xlu0 %v532_v62 }
 0x201   : > { %564 = vadd.xlane.f32.xlu1 %v533_v39 }
 0x26e   : > { %v539_v41 = vpop.xlane.xlu0 %538 }
 0x26f   : > { %v568_v63 = vmul.f32 0.0078125, %v539_v41 }
 0x271   : > { %v584_v42 = vadd.f32 1e-05, %v568_v63 }
 0x272   : > { %v541_v43 = vpop.xlane.xlu1 %540  ;;  %v555_v46 = vpop.xlane.xlu0 %554 }
 0x273   : > { %985 = vrsqrt.f32 %v584_v42  ;;  %v569_v0 = vmul.f32 0.0078125, %v541_v43  ;;  %v576_v48 = vmul.f32 0.0078125, %v555_v46 }
 0x275   : > { %v585_v49 = vadd.f32 1e-05, %v569_v0  ;;  %v592_v50 = vadd.f32 1e-05, %v576_v48 }
 0x276   : > { %v557_v51 = vpop.xlane.xlu1 %556  ;;  %v535_v47 = vpop.xlane.xlu0 %534 }
 0x277   : > { %987 = vrsqrt.f32 %v585_v49  ;;  %v577_v53 = vmul.f32 0.0078125, %v557_v51  ;;  %v566_v54 = vmul.f32 0.0078125, %v535_v47 }
 0x278   : > { %989 = vrsqrt.f32 %v592_v50 }
 0x279   : > { %v593_v55 = vadd.f32 1e-05, %v577_v53  ;;  %v582_v1 = vadd.f32 1e-05, %v566_v54 }
 0x27a   : > { %v537_v2 = vpop.xlane.xlu1 %536  ;;  %v551_v3 = vpop.xlane.xlu0 %550 }
 0x27b   : > { %991 = vrsqrt.f32 %v593_v55  ;;  %v567_v10 = vmul.f32 0.0078125, %v537_v2  ;;  %v574_v11 = vmul.f32 0.0078125, %v551_v3 }
 0x27c   : > { %993 = vrsqrt.f32 %v582_v1 }
 0x27d   : > { %v986_v13 = vpop.eup %985  ;;  %v583_v58 = vadd.f32 1e-05, %v567_v10  ;;  %v590_v23 = vadd.f32 1e-05, %v574_v11 }
 0x27e   : > { %v616_v59 = vmul.f32 %v986_v13, %v1423_v9  ;;  %v553_v31 = vpop.xlane.xlu1 %552  ;;  %v547_v60 = vpop.xlane.xlu0 %546 }
 0x27f   : > { %995 = vrsqrt.f32 %v583_v58  ;;  %v575_v34 = vmul.f32 0.0078125, %v553_v31  ;;  %v572_v35 = vmul.f32 0.0078125, %v547_v60 }
 0x280   : > { %v639_v38 = vmul.f32 %v1495_v22, %v616_v59  ;;  %997 = vrsqrt.f32 %v590_v23 }
 0x281   : > { %v988_v62 = vpop.eup %987  ;;  %v591_v39 = vadd.f32 1e-05, %v575_v34  ;;  %v588_v41 = vadd.f32 1e-05, %v572_v35 }
 0x282   : > { %v990_v63 = vpop.eup %989  ;;  %v662_v42 = vadd.f32 %v1501_v33, %v639_v38  ;;  %v617_v9 = vmul.f32 %v988_v62, %v1429_v24  ;;  %v549_v43 = vpop.xlane.xlu1 %548 }
 0x283   : > { %v543_v46 = vpop.xlane.xlu0 %542  ;;  %v624_v0 = vmul.f32 %v990_v63, %v1425_v12  ;;  %999 = vrsqrt.f32 %v591_v39  ;;  %v573_v48 = vmul.f32 0.0078125, %v549_v43 }
 0x284   : > { %v570_v49 = vmul.f32 0.0078125, %v543_v46  ;;  %v678_v50 = vmax.f32 %v662_v42, 0.0  ;;  %v640_v51 = vmul.f32 %v1495_v22, %v617_v9  ;;  %1001 = vrsqrt.f32 %v588_v41 }
 0x285   : > { %v992_v47 = vpop.eup %991  ;;  %v647_v53 = vmul.f32 %v1495_v22, %v624_v0  ;;  %v589_v54 = vadd.f32 1e-05, %v573_v48 }
 0x286   : > { %v586_v55 = vadd.f32 1e-05, %v570_v49  ;;  %v994_v1 = vpop.eup %993  ;;  %v694_v24 = vadd.f32 %v678_v50, %v1358_v14  ;;  %v663_v2 = vadd.f32 %v1501_v33, %v640_v51  ;;  %v625_v12 = vmul.f32 %v992_v47, %v1437_v36  ;;  %v545_v3 = vpop.xlane.xlu1 %544 }
 0x287   : > { %v559_v10 = vpop.xlane.xlu0 %558  ;;  %v670_v11 = vadd.f32 %v1501_v33, %v647_v53  ;;  %v614_v13 = vmul.f32 %v994_v1, %v1431_v25  ;;  %1003 = vrsqrt.f32 %v589_v54  ;;  %v571_v58 = vmul.f32 0.0078125, %v545_v3 }
 0x288   : > { %710 = vst [vmem:[%s1516_s10 + $0x10] sm:$0xff] %v694_v24  ;;  %v679_v23 = vmax.f32 %v663_v2, 0.0  ;;  %v648_v14 = vmul.f32 %v1495_v22, %v625_v12  ;;  %1005 = vrsqrt.f32 %v586_v55  ;;  %v578_v59 = vmul.f32 0.0078125, %v559_v10 }
 0x289   : > { %v996_v36 = vpop.eup %995  ;;  %v686_v31 = vmax.f32 %v670_v11, 0.0  ;;  %v637_v60 = vmul.f32 %v1495_v22, %v614_v13  ;;  %v587_v34 = vadd.f32 1e-05, %v571_v58 }
 0x28a   : > { %v998_v35 = vpop.eup %997  ;;  %v695_v25 = vadd.f32 %v679_v23, %v1361_v15  ;;  %v671_v38 = vadd.f32 %v1501_v33, %v648_v14  ;;  %v615_v62 = vmul.f32 %v996_v36, %v1445_v44  ;;  %v594_v39 = vadd.f32 1e-05, %v578_v59  ;;  %v561_v41 = vpop.xlane.xlu1 %560 }
 0x28b   : > { %v563_v63 = vpop.xlane.xlu0 %562  ;;  %v702_v42 = vadd.f32 %v686_v31, %v1364_v16  ;;  %v660_v9 = vadd.f32 %v1501_v33, %v637_v60  ;;  %v622_v43 = vmul.f32 %v998_v35, %v1441_v40  ;;  %1007 = vrsqrt.f32 %v587_v34 }
 0x28c   : > { %711 = vst [vmem:[%s1516_s10 + $0x18] sm:$0xff] %v695_v25  ;;  %v687_v46 = vmax.f32 %v671_v38, 0.0  ;;  %v638_v0 = vmul.f32 %v1495_v22, %v615_v62  ;;  %1009 = vrsqrt.f32 %v594_v39  ;;  %v579_v15 = vmul.f32 0.0078125, %v561_v41 }
 0x28d   : > { %v1000_v48 = vpop.eup %999  ;;  %718 = vst [vmem:[%s1516_s10 + $0x50] sm:$0xff] %v702_v42  ;;  %v676_v44 = vmax.f32 %v660_v9, 0.0  ;;  %v645_v49 = vmul.f32 %v1495_v22, %v622_v43  ;;  %v580_v50 = vmul.f32 0.0078125, %v563_v63 }
 0x28e   : > { %v1002_v51 = vpop.eup %1001  ;;  %v703_v16 = vadd.f32 %v687_v46, %v1367_v17  ;;  %v661_v40 = vadd.f32 %v1501_v33, %v638_v0  ;;  %v623_v47 = vmul.f32 %v1000_v48, %v1447_v45  ;;  %v595_v53 = vadd.f32 1e-05, %v579_v15  ;;  %v565_v54 = vpop.xlane.xlu1 %564 }
 0x28f   : > { %v692_v55 = vadd.f32 %v676_v44, %v1342_v4  ;;  %v668_v1 = vadd.f32 %v1501_v33, %v645_v49  ;;  %v620_v24 = vmul.f32 %v1002_v51, %v1453_v52  ;;  %v596_v2 = vadd.f32 1e-05, %v580_v50 }
 0x290   : > { %719 = vst [vmem:[%s1516_s10 + $0x58] sm:$0xff] %v703_v16  ;;  %v677_v12 = vmax.f32 %v661_v40, 0.0  ;;  %v646_v3 = vmul.f32 %v1495_v22, %v623_v47  ;;  %1011 = vrsqrt.f32 %v595_v53  ;;  %v581_v17 = vmul.f32 0.0078125, %v565_v54 }
 0x291   : > { %v1004_v10 = vpop.eup %1003  ;;  %708 = vst [vmem:[%s1516_s10] sm:$0xff] %v692_v55  ;;  %v684_v11 = vmax.f32 %v668_v1, 0.0  ;;  %v643_v45 = vmul.f32 %v1495_v22, %v620_v24  ;;  %1013 = vrsqrt.f32 %v596_v2 }
 0x292   : > { %v1006_v4 = vpop.eup %1005  ;;  %v693_v13 = vadd.f32 %v677_v12, %v1345_v5  ;;  %v669_v52 = vadd.f32 %v1501_v33, %v646_v3  ;;  %v621_v58 = vmul.f32 %v1004_v10, %v1457_v56  ;;  %v597_v23 = vadd.f32 1e-05, %v581_v17 }
 0x293   : > { %v700_v14 = vadd.f32 %v684_v11, %v1348_v6  ;;  %v666_v59 = vadd.f32 %v1501_v33, %v643_v45  ;;  %v618_v36 = vmul.f32 %v1006_v4, %v1461_v7 }
 0x294   : > { %709 = vst [vmem:[%s1516_s10 + $0x8] sm:$0xff] %v693_v13  ;;  %v685_v31 = vmax.f32 %v669_v52, 0.0  ;;  %v644_v60 = vmul.f32 %v1495_v22, %v621_v58  ;;  %1015 = vrsqrt.f32 %v597_v23 }
 0x295   : > { %v1008_v34 = vpop.eup %1007  ;;  %716 = vst [vmem:[%s1516_s10 + $0x40] sm:$0xff] %v700_v14  ;;  %v682_v5 = vmax.f32 %v666_v59, 0.0  ;;  %v641_v35 = vmul.f32 %v1495_v22, %v618_v36 }
 0x296   : > { %v1010_v56 = vpop.eup %1009  ;;  %v701_v25 = vadd.f32 %v685_v31, %v1353_v8  ;;  %v667_v6 = vadd.f32 %v1501_v33, %v644_v60  ;;  %v619_v38 = vmul.f32 %v1008_v34, %v1464_v57 }
 0x297   : > { %v698_v7 = vadd.f32 %v682_v5, %v1390_v26  ;;  %v664_v62 = vadd.f32 %v1501_v33, %v641_v35  ;;  %v626_v39 = vmul.f32 %v1010_v56, %v1471_v30 }
 0x298   : > { %717 = vst [vmem:[%s1516_s10 + $0x48] sm:$0xff] %v701_v25  ;;  %v683_v41 = vmax.f32 %v667_v6, 0.0  ;;  %v642_v63 = vmul.f32 %v1495_v22, %v619_v38 }
 0x299   : > { %714 = vst [vmem:[%s1516_s10 + $0x30] sm:$0xff] %v698_v7  ;;  %v680_v42 = vmax.f32 %v664_v62, 0.0  ;;  %v649_v8 = vmul.f32 %v1495_v22, %v626_v39 }
 0x29a   : > { %v1012_v9 = vpop.eup %1011  ;;  %v699_v43 = vadd.f32 %v683_v41, %v1393_v27  ;;  %v665_v57 = vadd.f32 %v1501_v33, %v642_v63 }
 0x29b   : > { %v1014_v26 = vpop.eup %1013  ;;  %v696_v46 = vadd.f32 %v680_v42, %v1370_v18  ;;  %v672_v30 = vadd.f32 %v1501_v33, %v649_v8  ;;  %v627_v0 = vmul.f32 %v1012_v9, %v1476_v32 }
 0x29c   : > { %715 = vst [vmem:[%s1516_s10 + $0x38] sm:$0xff] %v699_v43  ;;  %v681_v15 = vmax.f32 %v665_v57, 0.0  ;;  %v628_v48 = vmul.f32 %v1014_v26, %v1481_v37 }
 0x29d   : > { %712 = vst [vmem:[%s1516_s10 + $0x20] sm:$0xff] %v696_v46  ;;  %v688_v44 = vmax.f32 %v672_v30, 0.0  ;;  %v650_v27 = vmul.f32 %v1495_v22, %v627_v0 }
 0x29e   : > { %v1016_v49 = vpop.eup %1015  ;;  %v697_v50 = vadd.f32 %v681_v15, %v1373_v19  ;;  %v651_v18 = vmul.f32 %v1495_v22, %v628_v48 }
 0x29f   : > { %v704_v51 = vadd.f32 %v688_v44, %v1376_v20  ;;  %v673_v32 = vadd.f32 %v1501_v33, %v650_v27  ;;  %v629_v16 = vmul.f32 %v1016_v49, %v1484_v61 }
 0x2a0   : > { %713 = vst [vmem:[%s1516_s10 + $0x28] sm:$0xff] %v697_v50  ;;  %v674_v37 = vadd.f32 %v1501_v33, %v651_v18 }
 0x2a1   : > { %720 = vst [vmem:[%s1516_s10 + $0x60] sm:$0xff] %v704_v51  ;;  %v689_v40 = vmax.f32 %v673_v32, 0.0  ;;  %v652_v47 = vmul.f32 %v1495_v22, %v629_v16 }
 0x2a2   : > { %v690_v19 = vmax.f32 %v674_v37, 0.0 }
 0x2a3   : > { %v705_v53 = vadd.f32 %v689_v40, %v1379_v21  ;;  %v675_v20 = vadd.f32 %v1501_v33, %v652_v47 }
 0x2a4   : > { %v706_v54 = vadd.f32 %v690_v19, %v1396_v28 }
 0x2a5   : > { %721 = vst [vmem:[%s1516_s10 + $0x68] sm:$0xff] %v705_v53  ;;  %v691_v61 = vmax.f32 %v675_v20, 0.0 }
 0x2a6   : > { %722 = vst [vmem:[%s1516_s10 + $0x70] sm:$0xff] %v706_v54 }
 0x2a7   : > { %v707_v21 = vadd.f32 %v691_v61, %v1399_v29 }
 0x2a9   : > { %723 = vst [vmem:[%s1516_s10 + $0x78] sm:$0xff] %v707_v21 }
 0x2aa   : > { %1088 = shalt.err (!%p1085_p7)
}
 0x2ab   : > { %s1089_s26 = scalar_lea.hbm %s1589_s17, 2048  ;;  %s1093_s7 = scalar_lea.hbm %s1642_s5, 4096 }
 0x2ac   : > { %p1090_p9 = scmp.ne.s32.totalorder %s1589_s17, %s1089_s26  ;;  %p1094_p5 = scmp.lt.u32.totalorder %s1589_s17, %s1642_s5 }
 0x2ad   : > { %p1095_p11 = scmp.lt.u32.totalorder %s1093_s7, %s1089_s26  ;;  %p1097_p4 = scmp.lt.u32.totalorder %s1089_s26, %s1589_s17 }
 0x2ae   : > { %p1091_p2 = pnand %p1090_p9, %p1277_p12 }
 0x2af   : > { %p1096_p1 = por %p1095_p11, %p1094_p5 }
 0x2b0   : > { %p1092_p0 = pneg %p1091_p2 }
 0x2b1   : > { %p1098_p6 = por %p1097_p4, %p1096_p1 }
 0x2b3   : > { %p1099_p8 = pnand %p1098_p6, %p1092_p0 }
 0x2b5   : > { %1102 = shalt.err (!%p1099_p8)
}
 0x2b6   : > { %s1154_s29 = smov 128   ;;  %s1155_s28 = smov 8  }
 0x2b7   : > { %920 = dma.vmem_to_hbm [thread:$0]  (%p1277_p12), %s1591_s13, 2048, %s1589_s17, %s725_s22, %s1154_s29, %s1154_s29, %s1155_s28  }
 0x2b8 PF: > { %s753_s16 = sand.u32 1, %s1133_s18   ;;  %p1657_p10 = scmp.ne.s32.totalorder %s1647_s25, 0 }
 0x2b9   : > { %p1658_p13 = scmp.ge.s32.totalorder %s1145_s21, 2  ;;  %s754_s27 = scalar_lea.sflag [#allocation4], %s753_s16 }
 0x2bb   : > { %p931_p3 = pnand %p1658_p13, %p1657_p10 }
 0x2bd   : > { %1128 = dma.done.wait (!%p931_p3), %s754_s27, 2048  }
 0x2be   : > { %1130 = vsyncadd (!%p931_p3), %s754_s27, 4294965248  ;;  %p19_p7 = scmp.ge.s32.totalorder %s1242_s30, 4   ;;  %s1659_s18 = smov %s1137_s19 }
 0x2bf   : > { %s1660_s19 = smov %s1141_s20  ;;  %s1661_s20 = smov %s1273_s8 }
 0x2c0   : > { %s1662_s21 = smov %s1242_s30  ;;  %21 = sbr.rel (!%p19_p7) target bundleno = 6 (0x6), region = 89 }
 0x2c7   :  { %759 = vsyncpa [#allocation3], 1 }
 0x2c8   :  { %761 = vsyncpa [#allocation3 + $0x1], 1 }
 0x2c9   :  { %762 = vsyncpa [#allocation6], 1 }
 0x2ca   :  { %763 = vsyncpa [#allocation4], 1 }
 0x2cb   :  { %765 = vsyncpa [#allocation4 + $0x1], 1 }

</bundles_post_ra>
